<compile_context>
chip_gen: v7x
topology: tpu7x:2x2x1
jax: 0.10.0
libtpu: 0.0.40
codegen_flags: <defaults>
</compile_context>

<pallas_src>
import jax
import jax.numpy as jnp
from jax.experimental import pallas as pl
from jax.experimental.pallas import tpu as pltpu

NUM_AGENT = 20
HIDDEN = 64
LANE = 128


# ---------------------------------------------------------------------------
# Pallas kernel: the whole 4-layer MLP hot path.
# ---------------------------------------------------------------------------
def _critic_kernel(xu_ref, w_ref, b_ref, out_ref):
    bias = b_ref[...]                                  # [4, 128] f32

    def layer(x_bf16, li, relu):
        # bf16 x bf16 operands on the MXU, f32 accumulation.
        y = jnp.dot(x_bf16, w_ref[li], preferred_element_type=jnp.float32)
        y = y + bias[li:li + 1, :]                     # bias add in f32 (VPU)
        if relu:
            y = jnp.maximum(y, 0.0).astype(jnp.bfloat16)
        return y

    x = layer(xu_ref[...], 0, relu=True)               # [B, 128] (64 live)
    x = layer(x, 1, relu=True)
    x = layer(x, 2, relu=True)
    y = layer(x, 3, relu=False)                        # [B, 128] f32, lane dense
    out_ref[...] = y.astype(out_ref.dtype)


# ---------------------------------------------------------------------------
# Wrapper / parameter handling
# ---------------------------------------------------------------------------
def init_params(key, state_dim, action_dim_n):
    """PyTorch-equivalent init: xavier_uniform(gain=1) weights, zero biases.

    Weights are stored transposed vs PyTorch, i.e. (in_features, out_features),
    so the kernel computes y = x @ W + b directly on the MXU.
    """
    s_dim = state_dim + 5 * (NUM_AGENT - 1)
    a_dim = action_dim_n + 1
    d_in = s_dim + a_dim
    dims = [(d_in, HIDDEN), (HIDDEN, HIDDEN), (HIDDEN, HIDDEN), (HIDDEN, 1)]
    keys = jax.random.split(key, len(dims))
    params = []
    for k, (fi, fo) in zip(keys, dims):
        limit = (6.0 / (fi + fo)) ** 0.5
        w = jax.random.uniform(k, (fi, fo), jnp.float32, -limit, limit)
        b = jnp.zeros((fo,), jnp.float32)
        params.append((w, b))
    return params


def pack_params(params):
    """Pad / cast / pack all parameters into two slabs, outside the hot path."""
    (w1, b1), (w2, b2), (w3, b3), (w4, b4) = params
    d_in = w1.shape[0]
    assert d_in <= LANE, "first-layer fan-in must fit in one 128-lane tile"

    W = jnp.zeros((4, LANE, LANE), jnp.float32)
    W = W.at[0, :d_in, :HIDDEN].set(w1)
    W = W.at[1, :HIDDEN, :HIDDEN].set(w2)
    W = W.at[2, :HIDDEN, :HIDDEN].set(w3)
    W = W.at[3, :HIDDEN, :w4.shape[1]].set(w4)
    W = W.astype(jnp.bfloat16)                          # [4, 128, 128] bf16

    Bp = jnp.zeros((4, LANE), jnp.float32)
    Bp = Bp.at[0, :b1.shape[0]].set(b1)
    Bp = Bp.at[1, :b2.shape[0]].set(b2)
    Bp = Bp.at[2, :b3.shape[0]].set(b3)
    Bp = Bp.at[3, :b4.shape[0]].set(b4)                 # [4, 128] f32
    return W, Bp


def critic_forward(state, action, packed_params):
    """Pallas implementation of Critic.forward. Returns Q(s,a): [B, 1]."""
    W, Bp = packed_params
    xu = jnp.concatenate([state, action], axis=1)       # [B, d_in]
    B, d_in = xu.shape
    pB = ((B + 7) // 8) * 8                             # sublane-align batch
    xu = jnp.pad(xu, ((0, pB - B), (0, LANE - d_in))).astype(jnp.bfloat16)

    vmem = pl.BlockSpec(memory_space=pltpu.MemorySpace.VMEM)
    out = pl.pallas_call(
        _critic_kernel,
        out_shape=jax.ShapeDtypeStruct((pB, LANE), jnp.float32),
        in_specs=[vmem, vmem, vmem],
        out_specs=vmem,
    )(xu, W, Bp)
    return out[:B, :1]                                  # real Q is column 0


def critic_reference(state, action, params):
    """Plain-JAX reference with matching bf16 matmul operands / f32 accum."""
    xu = jnp.concatenate([state, action], axis=1)

    def dense(x, w, b):
        return jnp.dot(x.astype(jnp.bfloat16), w.astype(jnp.bfloat16),
                       preferred_element_type=jnp.float32) + b

    (w1, b1), (w2, b2), (w3, b3), (w4, b4) = params
    x = jax.nn.relu(dense(xu, w1, b1))
    x = jax.nn.relu(dense(x, w2, b2))
    x = jax.nn.relu(dense(x, w3, b3))
    return dense(x, w4, b4)


if __name__ == "__main__":
    # Small shapes consistent with the module:
    #   state_dim=10, action_dim.shape[0]=4, num_agent=20
    #   => forward's state width = 10 + 5*19 = 105, action width = 4+1 = 5,
    #      fcs1 in_features = 110, hidden = 64, output = [B, 1]
    state_dim, action_dim_n = 10, 4
    batch = 8
    s_width = state_dim + 5 * (NUM_AGENT - 1)   # 105
    a_width = action_dim_n + 1                  # 5

    key = jax.random.PRNGKey(0)
    kp, ks, ka = jax.random.split(key, 3)

    params = init_params(kp, state_dim, action_dim_n)
    packed = pack_params(params)

    state = jax.random.normal(ks, (batch, s_width), jnp.float32)
    action = jax.random.normal(ka, (batch, a_width), jnp.float32)

    q = critic_forward(state, action, packed)
    q = jax.block_until_ready(q)

    # sanity check against plain-JAX reference (same bf16 operand precision)
    ref = critic_reference(state, action, params)
    assert q.shape == (batch, 1)
    assert jnp.allclose(q, ref, atol=2e-3, rtol=2e-3)

    print("KERNEL_OK")
</pallas_src>

<mosaic_0001>
module attributes {stable_mosaic.version = 11 : i64} {
  func.func @_critic_kernel(%arg0: memref<8x128xbf16, #tpu.memory_space<vmem>>, %arg1: memref<4x128x128xbf16, #tpu.memory_space<vmem>>, %arg2: memref<4x128xf32, #tpu.memory_space<vmem>>, %arg3: memref<8x128xf32, #tpu.memory_space<vmem>>) attributes {dimension_semantics = [], scalar_prefetch = 0 : i64, scratch_operands = 0 : i64, tpu.core_type = #tpu.core_type<tc>} {
    %c0 = arith.constant 0 : index
    %c0_0 = arith.constant 0 : index
    %0 = vector.load %arg2[%c0, %c0_0] : memref<4x128xf32, #tpu.memory_space<vmem>>, vector<4x128xf32>
    %c0_1 = arith.constant 0 : index
    %c0_2 = arith.constant 0 : index
    %1 = vector.load %arg0[%c0_1, %c0_2] : memref<8x128xbf16, #tpu.memory_space<vmem>>, vector<8x128xbf16>
    %c0_3 = arith.constant 0 : index
    %c0_4 = arith.constant 0 : index
    %c0_5 = arith.constant 0 : index
    %2 = vector.load %arg1[%c0_3, %c0_4, %c0_5] : memref<4x128x128xbf16, #tpu.memory_space<vmem>>, vector<1x128x128xbf16>
    %3 = vector.shape_cast %2 : vector<1x128x128xbf16> to vector<128x128xbf16>
    %cst = arith.constant dense<0.000000e+00> : vector<8x128xf32>
    %4 = tpu.matmul %1, %3, %cst {dimension_numbers = #tpu.dot_dimension_numbers<[1], [0], [0], [1], [0, 0, 1, 1], [], []>} : vector<8x128xbf16>, vector<128x128xbf16>, vector<8x128xf32> -> vector<8x128xf32>
    %5 = vector.extract_strided_slice %0 {offsets = [0, 0], sizes = [1, 128], strides = [1, 1]} : vector<4x128xf32> to vector<1x128xf32>
    %6 = vector.broadcast %5 : vector<1x128xf32> to vector<8x128xf32>
    %7 = arith.addf %4, %6 : vector<8x128xf32>
    %cst_6 = arith.constant 0.000000e+00 : f32
    %8 = vector.broadcast %cst_6 : f32 to vector<8x128xf32>
    %9 = arith.maximumf %7, %8 : vector<8x128xf32>
    %10 = arith.truncf %9 : vector<8x128xf32> to vector<8x128xbf16>
    %c1 = arith.constant 1 : index
    %c0_7 = arith.constant 0 : index
    %c0_8 = arith.constant 0 : index
    %11 = vector.load %arg1[%c1, %c0_7, %c0_8] : memref<4x128x128xbf16, #tpu.memory_space<vmem>>, vector<1x128x128xbf16>
    %12 = vector.shape_cast %11 : vector<1x128x128xbf16> to vector<128x128xbf16>
    %cst_9 = arith.constant dense<0.000000e+00> : vector<8x128xf32>
    %13 = tpu.matmul %10, %12, %cst_9 {dimension_numbers = #tpu.dot_dimension_numbers<[1], [0], [0], [1], [0, 0, 1, 1], [], []>} : vector<8x128xbf16>, vector<128x128xbf16>, vector<8x128xf32> -> vector<8x128xf32>
    %14 = vector.extract_strided_slice %0 {offsets = [1, 0], sizes = [1, 128], strides = [1, 1]} : vector<4x128xf32> to vector<1x128xf32>
    %15 = vector.broadcast %14 : vector<1x128xf32> to vector<8x128xf32>
    %16 = arith.addf %13, %15 : vector<8x128xf32>
    %cst_10 = arith.constant 0.000000e+00 : f32
    %17 = vector.broadcast %cst_10 : f32 to vector<8x128xf32>
    %18 = arith.maximumf %16, %17 : vector<8x128xf32>
    %19 = arith.truncf %18 : vector<8x128xf32> to vector<8x128xbf16>
    %c2 = arith.constant 2 : index
    %c0_11 = arith.constant 0 : index
    %c0_12 = arith.constant 0 : index
    %20 = vector.load %arg1[%c2, %c0_11, %c0_12] : memref<4x128x128xbf16, #tpu.memory_space<vmem>>, vector<1x128x128xbf16>
    %21 = vector.shape_cast %20 : vector<1x128x128xbf16> to vector<128x128xbf16>
    %cst_13 = arith.constant dense<0.000000e+00> : vector<8x128xf32>
    %22 = tpu.matmul %19, %21, %cst_13 {dimension_numbers = #tpu.dot_dimension_numbers<[1], [0], [0], [1], [0, 0, 1, 1], [], []>} : vector<8x128xbf16>, vector<128x128xbf16>, vector<8x128xf32> -> vector<8x128xf32>
    %23 = vector.extract_strided_slice %0 {offsets = [2, 0], sizes = [1, 128], strides = [1, 1]} : vector<4x128xf32> to vector<1x128xf32>
    %24 = vector.broadcast %23 : vector<1x128xf32> to vector<8x128xf32>
    %25 = arith.addf %22, %24 : vector<8x128xf32>
    %cst_14 = arith.constant 0.000000e+00 : f32
    %26 = vector.broadcast %cst_14 : f32 to vector<8x128xf32>
    %27 = arith.maximumf %25, %26 : vector<8x128xf32>
    %28 = arith.truncf %27 : vector<8x128xf32> to vector<8x128xbf16>
    %c3 = arith.constant 3 : index
    %c0_15 = arith.constant 0 : index
    %c0_16 = arith.constant 0 : index
    %29 = vector.load %arg1[%c3, %c0_15, %c0_16] : memref<4x128x128xbf16, #tpu.memory_space<vmem>>, vector<1x128x128xbf16>
    %30 = vector.shape_cast %29 : vector<1x128x128xbf16> to vector<128x128xbf16>
    %cst_17 = arith.constant dense<0.000000e+00> : vector<8x128xf32>
    %31 = tpu.matmul %28, %30, %cst_17 {dimension_numbers = #tpu.dot_dimension_numbers<[1], [0], [0], [1], [0, 0, 1, 1], [], []>} : vector<8x128xbf16>, vector<128x128xbf16>, vector<8x128xf32> -> vector<8x128xf32>
    %32 = vector.extract_strided_slice %0 {offsets = [3, 0], sizes = [1, 128], strides = [1, 1]} : vector<4x128xf32> to vector<1x128xf32>
    %33 = vector.broadcast %32 : vector<1x128xf32> to vector<8x128xf32>
    %34 = arith.addf %31, %33 : vector<8x128xf32>
    %c0_18 = arith.constant 0 : index
    %c0_19 = arith.constant 0 : index
    %35 = vector.load %arg3[%c0_18, %c0_19] : memref<8x128xf32, #tpu.memory_space<vmem>>, vector<8x128xf32>
    tpu.vector_store %arg3[%c0_18, %c0_19], %34 {strides = array<i32>} : memref<8x128xf32, #tpu.memory_space<vmem>>, vector<8x128xf32>,
    return
  }
}

</mosaic_0001>

<bundles_post_ra>
// kernel: tpu_custom_call.1
= control target key start
LH: loop header
LB: loop body
LE: loop exit
PB: predicated region body
PF: predicated region fallthrough
CT: control target
= control target key end

     0   :  { %8 = vsyncpa [#allocation3], 0  ;;  %s880_s0 = inlined_call_operand.hbm [shape: bf16[8,128], index: 0, kind: input, shape index: {}]   ;;  %s881_s1 = inlined_call_operand.hbm [shape: bf16[4,128,128], index: 1, kind: input, shape index: {}]   ;;  %s882_s2 = inlined_call_operand.vmem [shape: f32[4,128], index: 2, kind: input, shape index: {}]   ;;  %s883_s3 = inlined_call_operand.hbm [shape: f32[8,128], index: 3, kind: output, shape index: {}]  }
   0x1   :  { %9 = vsyncpa [#allocation6], 0 }
   0x2   :  { %10 = vsyncpa [#allocation4], 0  ;;  %s761_s12 = smov [#allocation2]   ;;  %s762_s14 = smov [#allocation5]  }
   0x3   :  { %s17_s13 = sshll.u32 %s761_s12, 4  ;;  %s26_s15 = sshll.u32 %s762_s14, 4  ;;  %s18_s13 = int_to_ptr.vmem [resolvable:$true] %s17_s13  ;;  %s788_s15 = int_to_ptr.vmem [resolvable:$true] %s26_s15 }
   0x4   :  { %s689_s18 = scalar_lea.hbm %s880_s0, 64 }
   0x5   :  { %p690_p0 = scmp.ne.s32.totalorder %s880_s0, %s689_s18  ;;  %p693_p1 = scmp.lt.u32.totalorder %s689_s18, %s880_s0 }
   0x7   :  { %p695_p2 = pnand %p693_p1, %p690_p0 }
   0x9   :  { %698 = shalt.err (!%p695_p2)
}
   0xa   :  { %s699_s23 = scalar_lea.vmem %s18_s13, 64  ;;  %p704_p4 = scmp.lt.s32.totalorder %s18_s13, %s18_s13 }
   0xb   :  { %p700_p3 = scmp.ne.s32.totalorder %s18_s13, %s699_s23  ;;  %p705_p5 = scmp.lt.s32.totalorder %s699_s23, %s699_s23 }
   0xd   :  { %p706_p6 = por %p705_p5, %p704_p4 }
   0xf   :  { %p707_p7 = pnand %p706_p6, %p700_p3 }
  0x11   :  { %710 = shalt.err (!%p707_p7)
}
  0x12   :  { %20 = dma.hbm_to_vmem [thread:$0]  %s880_s0, 64, %s18_s13, [#allocation3]  }
  0x13   :  { %s711_s28 = scalar_lea.hbm %s881_s1, 4096 }
  0x14   :  { %p712_p8 = scmp.ne.s32.totalorder %s881_s1, %s711_s28  ;;  %p715_p9 = scmp.lt.u32.totalorder %s711_s28, %s881_s1 }
  0x16   :  { %p717_p10 = pnand %p715_p9, %p712_p8 }
  0x18   :  { %720 = shalt.err (!%p717_p10)
}
  0x19   :  { %s721_s6 = scalar_lea.vmem %s788_s15, 4096  ;;  %p726_p12 = scmp.lt.s32.totalorder %s788_s15, %s788_s15 }
  0x1a   :  { %p722_p11 = scmp.ne.s32.totalorder %s788_s15, %s721_s6  ;;  %p727_p13 = scmp.lt.s32.totalorder %s721_s6, %s721_s6 }
  0x1c   :  { %p728_p0 = por %p727_p13, %p726_p12 }
  0x1e   :  { %p729_p1 = pnand %p728_p0, %p722_p11 }
  0x20   :  { %732 = shalt.err (!%p729_p1)
}
  0x21   :  { %s763_s0 = smov 64   ;;  %s764_s7 = smov 4  }
  0x22   :  { %32 = dma.hbm_to_vmem [thread:$0]  %s881_s1, 4096, %s788_s15, [#allocation6], %s763_s0, %s763_s0, %s764_s7  }
  0x23   :  { %755 = dma.done.wait [#allocation3], 64  }
  0x24   :  { %756 = vsyncadd [#allocation3], 4294967232 }
  0x25   :  { %757 = dma.done.wait [#allocation6], 4096  }
  0x26   :  { %758 = vsyncadd [#allocation6], 4294963200  ;;  %v765_v0 = vmov 0.0   ;;  %vm766_vm0 = vmmov 0   ;;  %v657_v1 = vld [vmem:[#allocation5] sm:$0xff]   ;;  %v658_v2 = vld [vmem:[#allocation5 + $0x8] sm:$0xff]   ;;  %v60_v24 = vlaneseq }
  0x27   :  { %570 = vmatprep.subr.bf16.mxu0 %v765_v0  ;;  %586 = vmatprep.mubr.msk.bf16.mxu0 %vm766_vm0, %v765_v0  ;;  %v659_v3 = vld [vmem:[#allocation5 + $0x10] sm:$0xff]   ;;  %v665_v4 = vld [vmem:[#allocation5 + $0x40] sm:$0xff]   ;;  %v660_v5 = vld [vmem:[#allocation5 + $0x18] sm:$0xff]  }
  0x28   :  { %590 = vmatprep.subr.bf16.mxu1 %v765_v0  ;;  %606 = vmatprep.mubr.msk.bf16.mxu1 %vm766_vm0, %v765_v0  ;;  %v666_v6 = vld [vmem:[#allocation5 + $0x48] sm:$0xff]   ;;  %v661_v7 = vld [vmem:[#allocation5 + $0x20] sm:$0xff]   ;;  %v667_v8 = vld [vmem:[#allocation5 + $0x50] sm:$0xff]   ;;  %v849_v25 = vshrl.u32 %v60_v24, 7 }
  0x29   :  { %571 = vmatpush3.bf16.msra.mxu0 %v657_v1  ;;  %591 = vmatpush3.bf16.msra.mxu1 %v665_v4  ;;  %v662_v9 = vld [vmem:[#allocation5 + $0x28] sm:$0xff]   ;;  %v668_v10 = vld [vmem:[#allocation5 + $0x58] sm:$0xff]   ;;  %v663_v11 = vld [vmem:[#allocation5 + $0x30] sm:$0xff]  }
  0x2a   :  { %572 = vmatprep.subr.bf16.mxu0 %v765_v0  ;;  %592 = vmatprep.subr.bf16.mxu1 %v765_v0  ;;  %v669_v12 = vld [vmem:[#allocation5 + $0x60] sm:$0xff]   ;;  %v664_v13 = vld [vmem:[#allocation5 + $0x38] sm:$0xff]   ;;  %v670_v14 = vld [vmem:[#allocation5 + $0x68] sm:$0xff]   ;;  %v62_v26 = vsub.s32 0, %v849_v25  ;;  %v173_v44 = vsub.s32 1, %v849_v25  ;;  %v284_v55 = vsub.s32 2, %v849_v25 }
  0x2b   :  { %v43_v15 = vld [vmem:[#allocation2] sm:$0xf]  ;;  %v671_v16 = vld [vmem:[#allocation5 + $0x70] sm:$0xff]   ;;  %v673_v18 = vld [vmem:[#allocation5 + $0x80] sm:$0xff]   ;;  %v395_v1 = vsub.s32 3, %v849_v25 }
  0x2c   :  { %v672_v17 = vld [vmem:[#allocation5 + $0x78] sm:$0xff]   ;;  %v674_v19 = vld [vmem:[#allocation5 + $0x88] sm:$0xff]   ;;  %v675_v20 = vld [vmem:[#allocation5 + $0x90] sm:$0xff]  }
  0x2d   :  { %573 = vmatpush3.bf16.msra.mxu0 %v658_v2  ;;  %593 = vmatpush3.bf16.msra.mxu1 %v666_v6  ;;  %v676_v21 = vld [vmem:[#allocation5 + $0x98] sm:$0xff]   ;;  %v677_v22 = vld [vmem:[#allocation5 + $0xa0] sm:$0xff]   ;;  %v678_v23 = vld [vmem:[#allocation5 + $0xa8] sm:$0xff]  }
  0x2e   :  { %574 = vmatprep.subr.bf16.mxu0 %v765_v0  ;;  %594 = vmatprep.subr.bf16.mxu1 %v765_v0  ;;  %v42_v27 = vld [vmem:[%s882_s2] sm:$0xf]  ;;  %v679_v36 = vld [vmem:[#allocation5 + $0xb0] sm:$0xff]   ;;  %v681_v38 = vld [vmem:[#allocation5 + $0xc0] sm:$0xff]   ;;  %s767_s2 = smov [#allocation7]  }
  0x2f   :  { %v63_v28 = vrot.slane %v42_v27, %v62_v26  ;;  %v680_v37 = vld [vmem:[#allocation5 + $0xb8] sm:$0xff]   ;;  %v682_v39 = vld [vmem:[#allocation5 + $0xc8] sm:$0xff]   ;;  %v683_v40 = vld [vmem:[#allocation5 + $0xd0] sm:$0xff]   ;;  %v174_v45 = vrot.slane %v42_v27, %v173_v44  ;;  %v285_v56 = vrot.slane %v42_v27, %v284_v55  ;;  %v396_v2 = vrot.slane %v42_v27, %v395_v1  ;;  %s492_s11 = sshll.u32 %s767_s2, 4  ;;  %s493_s11 = int_to_ptr.vmem [resolvable:$true] %s492_s11 }
  0x30   :  { %v684_v41 = vld [vmem:[#allocation5 + $0xd8] sm:$0xff]   ;;  %v685_v42 = vld [vmem:[#allocation5 + $0xe0] sm:$0xff]   ;;  %v686_v43 = vld [vmem:[#allocation5 + $0xe8] sm:$0xff]   ;;  %s733_s12 = scalar_lea.vmem %s493_s11, 128  ;;  %p738_p3 = scmp.lt.s32.totalorder %s493_s11, %s493_s11 }
  0x31   :  { %575 = vmatpush3.bf16.msra.mxu0 %v659_v3  ;;  %595 = vmatpush3.bf16.msra.mxu1 %v667_v8  ;;  %v687_v53 = vld [vmem:[#allocation5 + $0xf0] sm:$0xff]   ;;  %v688_v54 = vld [vmem:[#allocation5 + $0xf8] sm:$0xff]   ;;  %p734_p2 = scmp.ne.s32.totalorder %s493_s11, %s733_s12  ;;  %p739_p4 = scmp.lt.s32.totalorder %s733_s12, %s733_s12 }
  0x32   :  { %576 = vmatprep.subr.bf16.mxu0 %v765_v0  ;;  %596 = vmatprep.subr.bf16.mxu1 %v765_v0 }
  0x33   :  { %p740_p5 = por %p739_p4, %p738_p3 }
  0x35   :  { %577 = vmatpush3.bf16.msra.mxu0 %v660_v5  ;;  %597 = vmatpush3.bf16.msra.mxu1 %v668_v10  ;;  %p741_p6 = pnand %p740_p5, %p734_p2 }
  0x36   :  { %578 = vmatprep.subr.bf16.mxu0 %v765_v0  ;;  %598 = vmatprep.subr.bf16.mxu1 %v765_v0 }
  0x39   :  { %579 = vmatpush3.bf16.msra.mxu0 %v661_v7  ;;  %599 = vmatpush3.bf16.msra.mxu1 %v669_v12 }
  0x3a   :  { %580 = vmatprep.subr.bf16.mxu0 %v765_v0  ;;  %600 = vmatprep.subr.bf16.mxu1 %v765_v0 }
  0x3d   :  { %581 = vmatpush3.bf16.msra.mxu0 %v662_v9  ;;  %601 = vmatpush3.bf16.msra.mxu1 %v670_v14 }
  0x3e   :  { %582 = vmatprep.subr.bf16.mxu0 %v765_v0  ;;  %602 = vmatprep.subr.bf16.mxu1 %v765_v0 }
  0x41   :  { %583 = vmatpush3.bf16.msra.mxu0 %v663_v11  ;;  %603 = vmatpush3.bf16.msra.mxu1 %v671_v16 }
  0x42   :  { %584 = vmatprep.subr.bf16.mxu0 %v765_v0  ;;  %604 = vmatprep.subr.bf16.mxu1 %v765_v0 }
  0x45   :  { %585 = vmatpush3.bf16.msra.mxu0 %v664_v13  ;;  %605 = vmatpush3.bf16.msra.mxu1 %v672_v17 }
  0x46   :  { %610 = vmatprep.subr.bf16.mxu0 %v765_v0  ;;  %630 = vmatprep.subr.bf16.mxu1 %v765_v0 }
  0x48   :  { %587 = vmatmul.mubr.bf16.vlgmr.msra.gmra.mrb[0].mxu0 %v43_v15 }
  0x49   :  { %626 = vmatprep.mubr.msk.bf16.mxu0 %vm766_vm0, %v765_v0  ;;  %611 = vmatpush3.bf16.msra.mxu0 %v673_v18 }
  0x4a   :  { %612 = vmatprep.subr.bf16.mxu0 %v765_v0 }
  0x4d   :  { %613 = vmatpush3.bf16.msra.mxu0 %v674_v19 }
  0x4e   :  { %614 = vmatprep.subr.bf16.mxu0 %v765_v0 }
  0x51   :  { %615 = vmatpush3.bf16.msra.mxu0 %v675_v20 }
  0x52   :  { %616 = vmatprep.subr.bf16.mxu0 %v765_v0 }
  0x55   :  { %617 = vmatpush3.bf16.msra.mxu0 %v676_v21 }
  0x56   :  { %618 = vmatprep.subr.bf16.mxu0 %v765_v0 }
  0x59   :  { %619 = vmatpush3.bf16.msra.mxu0 %v677_v22 }
  0x5a   :  { %620 = vmatprep.subr.bf16.mxu0 %v765_v0 }
  0x5d   :  { %621 = vmatpush3.bf16.msra.mxu0 %v678_v23 }
  0x5e   :  { %622 = vmatprep.subr.bf16.mxu0 %v765_v0 }
  0x61   :  { %623 = vmatpush3.bf16.msra.mxu0 %v679_v36 }
  0x62   :  { %624 = vmatprep.subr.bf16.mxu0 %v765_v0 }
  0x65   :  { %625 = vmatpush3.bf16.msra.mxu0 %v680_v37 }
 0x11b   :  { %v146_v29 = vpop.f32.mrb[0].mxu0 }
 0x11c   :  { %v147_v30 = vadd.f32 %v146_v29, %v63_v28  ;;  %v588_v31 = vpop.f32.mrb[1].mxu0 }
 0x11d   :  { %v149_v32 = vpop.f32.mrb[2].mxu0 }
 0x11e   :  { %v152_v33 = vmax.f32 %v147_v30, 0.0  ;;  %v589_v34 = vpop.f32.mrb[3].mxu0 }
 0x120   :  { %v153_v35 = vpack.c.bf16 %v152_v33, %v152_v33 }
 0x122   :  { %607 = vmatmul.mubr.bf16.vlgmr.msra.gmra.mrb[0].mxu1 %v153_v35 }
 0x123   :  { %646 = vmatprep.mubr.msk.bf16.mxu1 %vm766_vm0, %v765_v0  ;;  %631 = vmatpush3.bf16.msra.mxu1 %v681_v38 }
 0x124   :  { %632 = vmatprep.subr.bf16.mxu1 %v765_v0 }
 0x127   :  { %633 = vmatpush3.bf16.msra.mxu1 %v682_v39 }
 0x128   :  { %634 = vmatprep.subr.bf16.mxu1 %v765_v0 }
 0x12b   :  { %635 = vmatpush3.bf16.msra.mxu1 %v683_v40 }
 0x12c   :  { %636 = vmatprep.subr.bf16.mxu1 %v765_v0 }
 0x12f   :  { %637 = vmatpush3.bf16.msra.mxu1 %v684_v41 }
 0x130   :  { %638 = vmatprep.subr.bf16.mxu1 %v765_v0 }
 0x133   :  { %639 = vmatpush3.bf16.msra.mxu1 %v685_v42 }
 0x134   :  { %640 = vmatprep.subr.bf16.mxu1 %v765_v0 }
 0x137   :  { %641 = vmatpush3.bf16.msra.mxu1 %v686_v43 }
 0x138   :  { %642 = vmatprep.subr.bf16.mxu1 %v765_v0 }
 0x13b   :  { %643 = vmatpush3.bf16.msra.mxu1 %v687_v53 }
 0x13c   :  { %644 = vmatprep.subr.bf16.mxu1 %v765_v0 }
 0x13f   :  { %645 = vmatpush3.bf16.msra.mxu1 %v688_v54 }
 0x1f5   :  { %v257_v46 = vpop.f32.mrb[0].mxu1 }
 0x1f6   :  { %v258_v47 = vadd.f32 %v257_v46, %v174_v45  ;;  %v608_v48 = vpop.f32.mrb[1].mxu1 }
 0x1f7   :  { %v260_v49 = vpop.f32.mrb[2].mxu1 }
 0x1f8   :  { %v263_v50 = vmax.f32 %v258_v47, 0.0  ;;  %v609_v51 = vpop.f32.mrb[3].mxu1 }
 0x1fa   :  { %v264_v52 = vpack.c.bf16 %v263_v50, %v263_v50 }
 0x1fc   :  { %627 = vmatmul.mubr.bf16.vlgmr.msra.gmra.mrb[4].mxu0 %v264_v52 }
 0x2cf   :  { %v368_v57 = vpop.f32.mrb[4].mxu0 }
 0x2d0   :  { %v369_v58 = vadd.f32 %v368_v57, %v285_v56  ;;  %v628_v59 = vpop.f32.mrb[5].mxu0 }
 0x2d1   :  { %v371_v60 = vpop.f32.mrb[6].mxu0 }
 0x2d2   :  { %v374_v61 = vmax.f32 %v369_v58, 0.0  ;;  %v629_v62 = vpop.f32.mrb[7].mxu0 }
 0x2d4   :  { %v375_v63 = vpack.c.bf16 %v374_v61, %v374_v61 }
 0x2d6   :  { %647 = vmatmul.mubr.bf16.vlgmr.msra.gmra.mrb[4].mxu1 %v375_v63 }
 0x3a9   :  { %v479_v3 = vpop.f32.mrb[4].mxu1 }
 0x3aa   :  { %v480_v0 = vadd.f32 %v479_v3, %v396_v2  ;;  %v648_v4 = vpop.f32.mrb[5].mxu1 }
 0x3ab   :  { %v482_v5 = vpop.f32.mrb[6].mxu1 }
 0x3ac   :  { %485 = vst [vmem:[#allocation7] sm:$0xff] %v480_v0  ;;  %v649_v6 = vpop.f32.mrb[7].mxu1 }
 0x3ad   :  { %744 = shalt.err (!%p741_p6)
}
 0x3ae   :  { %s745_s15 = scalar_lea.hbm %s883_s3, 128 }
 0x3af   :  { %p746_p7 = scmp.ne.s32.totalorder %s883_s3, %s745_s15  ;;  %p749_p8 = scmp.lt.u32.totalorder %s745_s15, %s883_s3 }
 0x3b1   :  { %p751_p9 = pnand %p749_p8, %p746_p7 }
 0x3b3   :  { %754 = shalt.err (!%p751_p9)
}
 0x3b4   :  { %495 = dma.vmem_to_hbm [thread:$0]  %s493_s11, 128, %s883_s3, [#allocation4]  }
 0x3b5   :  { %759 = dma.done.wait [#allocation4], 128  }
 0x3b6   :  { %760 = vsyncadd [#allocation4], 4294967168 }
 0x3b7   :  { %499 = vsyncpa [#allocation3], 1 }
 0x3b8   :  { %500 = vsyncpa [#allocation6], 1 }
 0x3b9   :  { %501 = vsyncpa [#allocation4], 1 }

</bundles_post_ra>
